<compile_context>
chip_gen: v7x
topology: tpu7x:2x2x1
jax: 0.10.0
libtpu: 0.0.40
codegen_flags: <defaults>
</compile_context>

<pallas_src>
import functools

import jax
import jax.numpy as jnp
from jax.experimental import pallas as pl
from jax.experimental.pallas import tpu as pltpu


# --------------------------------------------------------------------------- #
# Kernel
# --------------------------------------------------------------------------- #
def _hswish_kernel(x_ref, o_ref):
    x = x_ref[...]
    # relu6(x + 3) == clamp(x + 3, 0, 6); hswish = x * relu6(x + 3) / 6.
    # Weak-typed constants keep the math in the input dtype (PyTorch-half-like
    # for bf16/f16); compute has plenty of slack, HBM DMA is the bottleneck.
    r6 = jnp.clip(x + 3.0, 0.0, 6.0)
    o_ref[...] = x * r6 * (1.0 / 6.0)


def _hswish_jnp(x):
    """Plain-jnp reference / tiny-input & tail path."""
    return x * jnp.clip(x + 3.0, 0.0, 6.0) * (1.0 / 6.0)


# --------------------------------------------------------------------------- #
# Per-generation tiling plan
# --------------------------------------------------------------------------- #
@functools.lru_cache(maxsize=1)
def _tpu_generation():
    """Best-effort TPU generation (5/6/7/...); None if undetectable."""
    # 1) Mosaic trace-time hardware query.
    try:
        info = pltpu.get_tpu_info()
        for attr in ("chip_version", "version", "generation", "chip"):
            v = getattr(info, attr, None)
            if v is None:
                continue
            s = str(v)
            for g in (7, 6, 5, 4, 3):
                if str(g) in s:
                    return g
    except Exception:
        pass
    # 2) Device-kind string, e.g. "TPU v5 lite", "TPU v6e", "TPU7x".
    try:
        kind = jax.devices()[0].device_kind.lower()
        for g in (7, 6, 5, 4, 3):
            if f"v{g}" in kind or f"tpu{g}" in kind:
                return g
    except Exception:
        pass
    return None


def _block_plan():
    """(block_bytes, vmem_limit_bytes_or_None) per chip generation.

    Double-buffered in+out footprint is ~4x block_bytes.
    """
    gen = _tpu_generation()
    if gen is not None and gen >= 7:
        # v7x: fast HBM makes per-step overhead relatively bigger -> bigger
        # blocks; VMEM is only 64 MiB/TC so keep footprint <= 32 MiB (explicit).
        return 6 * 1024 * 1024, 32 * 1024 * 1024
    if gen == 6:
        # v6e: 16 MiB footprint; set the 32 MiB limit explicitly for safety.
        return 4 * 1024 * 1024, 32 * 1024 * 1024
    # v5e / older / unknown: stay within the 16 MiB scoped-VMEM default.
    return 2 * 1024 * 1024, None


# --------------------------------------------------------------------------- #
# Layout selection (all copy-free except the rare fallback)
# --------------------------------------------------------------------------- #
def _cdiv(a, b):
    return (a + b - 1) // b


def _round_up(a, b):
    return _cdiv(a, b) * b


def _choose_layout(shape, n):
    """Return (rows, cols) for a copy-free 2-D view of the flat data, or None.

    cols is the lane (last) dim. A contiguous row-major collapse/re-split
    reshape is a bitcast in XLA, so these views cost no HBM traffic.
    """
    # (1) n divisible by 128: flat re-split with the widest lane-dense width.
    if n % 128 == 0:
        for cand in (1024, 512, 256, 128):
            if n % cand == 0 and n // cand >= 8:
                return n // cand, cand
        return n // 128, 128
    # (2) Ragged n: collapse trailing dims of the original shape. A full-extent
    #     last dim is always a legal block dim even if not a multiple of 128;
    #     lane-padding waste is small once the trailing product is >= 256 and
    #     the op stays HBM-bound.
    t = 1
    for d in reversed(shape):
        t *= int(d)
        if t >= 256 and n % t == 0 and n // t >= 8:
            return n // t, t
    return None


# --------------------------------------------------------------------------- #
# Pallas wrapper
# --------------------------------------------------------------------------- #
_TARGET_GRID_STEPS = 8  # >=2 blocks for v7x megacore + DMA/writeback overlap
_MIN_KERNEL_ELEMS = 1024


def _hswish_2d(x2d):
    rows, cols = x2d.shape
    dtype = x2d.dtype
    itemsize = jnp.dtype(dtype).itemsize

    block_bytes, vmem_limit = _block_plan()
    # f32 -> 8, bf16/f16 -> 16, int8/fp8 -> 32 (sub-32-bit packs along sublanes)
    sub = max(8, 32 // max(1, itemsize))
    lanes_padded = _round_up(cols, 128)  # in-VMEM footprint per row
    budget_rows = max(sub, ((block_bytes // (lanes_padded * itemsize)) // sub) * sub)

    if rows <= sub:
        # Tiny input: one full-extent block (always a legal block shape).
        block_rows = rows
        grid = (1,)
    else:
        # Aim for ~_TARGET_GRID_STEPS blocks (capped by the VMEM budget) so the
        # "parallel" grid can shard across v7x's 2 TensorCores and block i+1's
        # input DMA overlaps block i's output writeback. cdiv grid: Pallas
        # masks the partial last block's writeback.
        block_rows = min(budget_rows, _round_up(_cdiv(rows, _TARGET_GRID_STEPS), sub))
        grid = (_cdiv(rows, block_rows),)

    n_k = rows * cols
    return pl.pallas_call(
        _hswish_kernel,
        out_shape=jax.ShapeDtypeStruct((rows, cols), dtype),
        grid_spec=pltpu.PrefetchScalarGridSpec(
            num_scalar_prefetch=0,
            grid=grid,
            in_specs=[pl.BlockSpec((block_rows, cols), lambda i: (i, 0))],
            out_specs=pl.BlockSpec((block_rows, cols), lambda i: (i, 0)),
        ),
        compiler_params=pltpu.CompilerParams(
            dimension_semantics=("parallel",),
            vmem_limit_bytes=vmem_limit,
        ),
        cost_estimate=pl.CostEstimate(
            flops=5 * n_k,
            transcendentals=0,
            bytes_accessed=2 * n_k * itemsize,
        ),
        # NOTE: if the caller donates x, add input_output_aliases={0: 0} here to
        # write in place (saves the output HBM allocation; do NOT enable it for
        # non-donated inputs or x gets clobbered).
    )(x2d)


@jax.jit
def hswish(x: jax.Array) -> jax.Array:
    """Elementwise HSwish (x * relu6(x + 3) / 6) via a Pallas TPU kernel."""
    orig_shape = x.shape
    n = x.size
    if n == 0 or n < _MIN_KERNEL_ELEMS:
        # Too small for a lane-dense tile; launch overhead would dominate.
        return _hswish_jnp(x)

    layout = _choose_layout(orig_shape, n)
    if layout is not None:
        rows, cols = layout
        out2d = _hswish_2d(x.reshape(rows, cols))  # copy-free view in & out
        return out2d.reshape(orig_shape)

    # Rare fallback (no copy-free 2-D view exists): run the kernel on the
    # 128-aligned bulk and compute the <128-element tail with plain jnp.
    # TODO(synk): a fully copy-free ragged path would need 1-D blocks or a
    # manual-DMA output, both of which cost more than they save here.
    flat = x.reshape(-1)
    n_bulk = (n // 128) * 128
    bulk_out = _hswish_2d(flat[:n_bulk].reshape(n_bulk // 128, 128))
    tail_out = _hswish_jnp(flat[n_bulk:])
    return jnp.concatenate([bulk_out.reshape(-1), tail_out]).reshape(orig_shape)


def hswish_ref(x):
    return x * jnp.clip(x + 3.0, 0.0, 6.0) / 6.0


# --------------------------------------------------------------------------- #
# Self-test
# --------------------------------------------------------------------------- #
if __name__ == "__main__":
    key = jax.random.PRNGKey(0)

    # 1) NCHW input matching the PyTorch module's typical use (divisible path,
    #    single full-extent block).
    x = jax.random.normal(key, (2, 4, 16, 16), dtype=jnp.float32)
    out = jax.block_until_ready(hswish(x))
    assert out.shape == x.shape and out.dtype == x.dtype
    assert jnp.allclose(out, hswish_ref(x), atol=1e-6, rtol=1e-6)

    # 2) Larger divisible shape -> multi-block grid (exercises megacore split
    #    and the partial last block's masked writeback).
    y = jax.random.normal(jax.random.PRNGKey(1), (4, 16, 28, 28), dtype=jnp.float32)
    out_y = jax.block_until_ready(hswish(y))
    assert jnp.allclose(out_y, hswish_ref(y), atol=1e-6, rtol=1e-6)

    # 3) Ragged element count -> copy-free trailing-dim collapse path
    #    ((3*7, 33*19) view, full-extent lane dim of 627).
    z = jax.random.normal(jax.random.PRNGKey(2), (3, 7, 33, 19), dtype=jnp.float32)
    out_z = jax.block_until_ready(hswish(z))
    assert jnp.allclose(out_z, hswish_ref(z), atol=1e-6, rtol=1e-6)

    # 4) Pathological ragged shape with no good factorization -> bulk + tail
    #    fallback path.
    w = jax.random.normal(jax.random.PRNGKey(3), (5, 241), dtype=jnp.float32)
    out_w = jax.block_until_ready(hswish(w))
    assert jnp.allclose(out_w, hswish_ref(w), atol=1e-6, rtol=1e-6)

    print("KERNEL_OK")
</pallas_src>

<mosaic_0001>
module attributes {stable_mosaic.version = 11 : i64} {
  func.func @_hswish_kernel(%arg0: i32, %arg1: memref<8x256xf32, #tpu.memory_space<vmem>>, %arg2: memref<8x256xf32, #tpu.memory_space<vmem>>) attributes {dimension_semantics = [#tpu.dimension_semantics<parallel>], iteration_bounds = array<i64: 1>, scalar_prefetch = 0 : i64, scratch_operands = 0 : i64, tpu.core_type = #tpu.core_type<tc>, window_params = [{transform_indices = @transform_0, window_bounds = array<i64: 8, 256>}, {transform_indices = @transform_1, window_bounds = array<i64: 8, 256>}]} {
    %c0 = arith.constant 0 : index
    %c0_0 = arith.constant 0 : index
    %0 = vector.load %arg1[%c0, %c0_0] : memref<8x256xf32, #tpu.memory_space<vmem>>, vector<8x256xf32>
    %cst = arith.constant 3.000000e+00 : f32
    %1 = vector.broadcast %cst : f32 to vector<8x256xf32>
    %2 = arith.addf %0, %1 : vector<8x256xf32>
    %cst_1 = arith.constant 0.000000e+00 : f32
    %cst_2 = arith.constant 6.000000e+00 : f32
    %3 = vector.broadcast %cst_1 : f32 to vector<8x256xf32>
    %4 = arith.maximumf %3, %2 : vector<8x256xf32>
    %5 = vector.broadcast %cst_2 : f32 to vector<8x256xf32>
    %6 = arith.minimumf %5, %4 : vector<8x256xf32>
    %7 = arith.mulf %0, %6 : vector<8x256xf32>
    %cst_3 = arith.constant 0.166666672 : f32
    %8 = vector.broadcast %cst_3 : f32 to vector<8x256xf32>
    %9 = arith.mulf %7, %8 : vector<8x256xf32>
    %c0_4 = arith.constant 0 : index
    %c0_5 = arith.constant 0 : index
    %10 = vector.load %arg2[%c0_4, %c0_5] : memref<8x256xf32, #tpu.memory_space<vmem>>, vector<8x256xf32>
    tpu.vector_store %arg2[%c0_4, %c0_5], %9 {strides = array<i32>} : memref<8x256xf32, #tpu.memory_space<vmem>>, vector<8x256xf32>,
    return
  }
  func.func @transform_0(%arg0: i32) -> (i32, i32) {
    %c0_i32 = arith.constant 0 : i32
    %c0_i32_0 = arith.constant 0 : i32
    return %arg0, %c0_i32 : i32, i32
  }
  func.func @transform_1(%arg0: i32) -> (i32, i32) {
    %c0_i32 = arith.constant 0 : i32
    %c0_i32_0 = arith.constant 0 : i32
    return %arg0, %c0_i32 : i32, i32
  }
}

</mosaic_0001>

<bundles_post_ra>
// kernel: hswish.1
= control target key start
LH: loop header
LB: loop body
LE: loop exit
PB: predicated region body
PF: predicated region fallthrough
CT: control target
= control target key end

     0   :  { %s48_s0 = inlined_call_operand.vmem [shape: f32[8,256], index: 0, kind: input, shape index: {}]   ;;  %s49_s1 = inlined_call_operand.vmem [shape: f32[8,256], index: 1, kind: output, shape index: {}]  }
   0x1   :  { %v8_v0 = vld [vmem:[%s48_s0] sm:$0xff]  ;;  %v9_v1 = vld [vmem:[%s48_s0 + $0x8] sm:$0xff] }
   0x2   :  { %v10_v2 = vadd.f32 3.0, %v8_v0  ;;  %v11_v3 = vadd.f32 3.0, %v9_v1 }
   0x4   :  { %v12_v4 = vmax.f32 %v10_v2, 0.0  ;;  %v13_v5 = vmax.f32 %v11_v3, 0.0 }
   0x6   :  { %v14_v6 = vmin.f32 %v12_v4, 6.0  ;;  %v15_v7 = vmin.f32 %v13_v5, 6.0 }
   0x8   :  { %v16_v8 = vmul.f32 %v14_v6, %v8_v0  ;;  %v17_v9 = vmul.f32 %v15_v7, %v9_v1 }
   0xa   :  { %v18_v10 = vmul.f32 0.16666667, %v16_v8  ;;  %v19_v11 = vmul.f32 0.16666667, %v17_v9 }
   0xc   :  { %20 = vst [vmem:[%s49_s1] sm:$0xff] %v18_v10  ;;  %21 = vst [vmem:[%s49_s1 + $0x8] sm:$0xff] %v19_v11 }

</bundles_post_ra>
